<compile_context>
chip_gen: v6e
topology: v6e:2x2x1
jax: 0.10.0
libtpu: 0.0.40
codegen_flags: <defaults>
</compile_context>

<pallas_src>
import functools

import jax
import jax.numpy as jnp
from jax.experimental import pallas as pl
from jax.experimental.pallas import tpu as pltpu

_LANES = 128
_SUBLANES = 8


def _fold_to_8x128(sq):
    """Fold (tile_s, 128) -> (1, 8, 128) with sublane-aligned VPU adds."""
    return jnp.sum(sq.reshape(-1, _SUBLANES, _LANES), axis=0, keepdims=True)


def _even_dist_kernel(x_ref, o_ref, *scratch, inv_b, num_b):
    """One grid step.

    x_ref:   (tile_b, tile_s, 128) VMEM tile of the padded input.
    o_ref:   (1, 8, 128) f32 partial-sum accumulator (resident per core).
    scratch: () when num_b == 1, else ((tile_s, 128) f32 column-sum scratch,).
    """
    j = pl.program_id(1)          # feature-tile index (within this core)

    # Keep HBM traffic in the source dtype (bf16 passes through); compute f32.
    x = x_ref[...].astype(jnp.float32)          # (tile_b, tile_s, 128)
    s = jnp.sum(x, axis=0)                      # cross-vreg VPU adds only

    if num_b == 1:
        # Fast path: whole batch fits in one block -> no scratch traffic.
        m = s * inv_b
        folded = _fold_to_8x128(m * m)

        @pl.when(j == 0)
        def _():
            o_ref[...] = folded

        @pl.when(j > 0)
        def _():
            o_ref[...] += folded
    else:
        colsum_ref = scratch[0]
        b = pl.program_id(2)                    # batch-tile index (innermost)

        # Write-then-accumulate: avoids a separate zero-init pass.
        @pl.when(b == 0)
        def _():
            colsum_ref[...] = s

        @pl.when(b > 0)
        def _():
            colsum_ref[...] += s

        @pl.when(b == num_b - 1)
        def _():
            m = colsum_ref[...] * inv_b         # per-feature batch mean
            folded = _fold_to_8x128(m * m)

            @pl.when(j == 0)
            def _():
                o_ref[...] = folded

            @pl.when(j > 0)
            def _():
                o_ref[...] += folded


def even_distribute_loss(x, *, target_block_bytes=4 * 1024 * 1024,
                         max_tile_s=8192):
    """Pallas TPU implementation of Even_distributeLoss.forward."""
    B = x.shape[0]
    size1 = x.shape[1]                           # torch's input.size(1) (= C)
    x2 = x.reshape(B, -1)
    D = x2.shape[1]
    itemsize = jnp.dtype(x.dtype).itemsize

    # ---- tile sizes chosen from a VMEM/bandwidth budget, not from D ----
    S = pl.cdiv(D, _LANES)                       # feature rows of 128 lanes
    # batch tile: keep (tile_b, 8, 128) within the block budget
    max_tile_b = max(1, target_block_bytes // (_SUBLANES * _LANES * itemsize))
    tile_b = min(B, max_tile_b)
    # feature tile: multiple of 8 sublanes, capped by budget / scratch / data
    ts_budget = target_block_bytes // (tile_b * _LANES * itemsize)
    ts_budget = max(_SUBLANES, (ts_budget // _SUBLANES) * _SUBLANES)
    tile_s = max(_SUBLANES,
                 min(ts_budget, max_tile_s, pl.cdiv(S, _SUBLANES) * _SUBLANES))

    num_b = pl.cdiv(B, tile_b)
    b_pad = num_b * tile_b
    num_s = pl.cdiv(S, tile_s)
    # Split feature tiles across the two TensorCores on megacore parts (v7x);
    # degenerates to a size-1 axis when there is only one feature tile.
    n_split = 2 if num_s > 1 else 1
    num_s = pl.cdiv(num_s, n_split) * n_split
    num_s_half = num_s // n_split
    s_pad = num_s * tile_s
    d_pad = s_pad * _LANES

    # Zero padding is semantically neutral: padded rows don't change column
    # sums (we divide by the true B), padded columns have mean 0.  Skipped
    # entirely (no extra HBM copy) when shapes already line up.
    if b_pad != B or d_pad != D:
        x2 = jnp.pad(x2, ((0, b_pad - B), (0, d_pad - D)))
    x3 = x2.reshape(b_pad, s_pad, _LANES)

    scratch_shapes = []
    if num_b > 1:
        scratch_shapes.append(pltpu.VMEM((tile_s, _LANES), jnp.float32))

    partials = pl.pallas_call(
        functools.partial(_even_dist_kernel, inv_b=1.0 / B, num_b=num_b),
        out_shape=jax.ShapeDtypeStruct((n_split, _SUBLANES, _LANES),
                                       jnp.float32),
        grid_spec=pltpu.PrefetchScalarGridSpec(
            num_scalar_prefetch=0,
            grid=(n_split, num_s_half, num_b),
            in_specs=[pl.BlockSpec(
                (tile_b, tile_s, _LANES),
                lambda p, j, b: (b, p * num_s_half + j, 0))],
            out_specs=pl.BlockSpec((1, _SUBLANES, _LANES),
                                   lambda p, j, b: (p, 0, 0)),
            scratch_shapes=scratch_shapes,
        ),
        compiler_params=pltpu.CompilerParams(
            dimension_semantics=("parallel", "arbitrary", "arbitrary"),
            vmem_limit_bytes=32 * 1024 * 1024),
        cost_estimate=pl.CostEstimate(
            flops=2 * B * D,
            transcendentals=0,
            bytes_accessed=b_pad * d_pad * itemsize
            + n_split * _SUBLANES * _LANES * 4),
    )(x3)

    # Final cross-lane reduce + 1 / (2 * input.size(1)) scale in the wrapper.
    return jnp.sum(partials) * (0.5 / size1)


def _reference(x):
    mean1 = jnp.mean(x.astype(jnp.float32), axis=0)
    return jnp.sum(mean1 ** 2) / 2.0 / x.shape[1]


if __name__ == "__main__":
    key = jax.random.PRNGKey(0)
    k0, k1, k2, k3 = jax.random.split(key, 4)

    # NCHW input like the PyTorch module would receive (single-block fast path).
    x_a = jax.random.normal(k0, (2, 4, 16, 16), dtype=jnp.float32)
    # Awkward (non-128-divisible) shape: exercises zero-padding, C != D // C.
    x_b = jax.random.normal(k1, (3, 5, 7, 9), dtype=jnp.float32)
    # bf16 pass-through: HBM traffic stays bf16, compute is f32 in-kernel.
    x_c = jax.random.normal(k2, (4, 8, 33), dtype=jnp.bfloat16)

    for xin in (x_a, x_b, x_c):
        loss = jax.block_until_ready(even_distribute_loss(xin))
        ref = jax.block_until_ready(_reference(xin))
        assert jnp.allclose(loss, ref, rtol=1e-4, atol=1e-6), (xin.shape, loss, ref)

    # Tiny block budget forces num_b > 1: exercises the scratch-accumulator
    # (multi-batch-tile) path without needing a large input.
    x_d = jax.random.normal(k3, (16, 4, 16, 16), dtype=jnp.float32)
    loss = jax.block_until_ready(
        even_distribute_loss(x_d, target_block_bytes=8 * 1024))
    ref = jax.block_until_ready(_reference(x_d))
    assert jnp.allclose(loss, ref, rtol=1e-4, atol=1e-6), (x_d.shape, loss, ref)

    print("KERNEL_OK")
</pallas_src>

<mosaic_0001>
module attributes {stable_mosaic.version = 11 : i64} {
  func.func @_even_dist_kernel(%arg0: i32, %arg1: i32, %arg2: i32, %arg3: memref<2x8x128xf32, #tpu.memory_space<vmem>>, %arg4: memref<1x8x128xf32, #tpu.memory_space<vmem>>) attributes {dimension_semantics = [#tpu.dimension_semantics<parallel>, #tpu.dimension_semantics<arbitrary>, #tpu.dimension_semantics<arbitrary>], iteration_bounds = array<i64: 1, 1, 1>, scalar_prefetch = 0 : i64, scratch_operands = 0 : i64, tpu.core_type = #tpu.core_type<tc>, window_params = [{transform_indices = @transform_0, window_bounds = array<i64: 2, 8, 128>}, {transform_indices = @transform_1, window_bounds = array<i64: 1, 8, 128>}]} {
    %c0 = arith.constant 0 : index
    %c0_0 = arith.constant 0 : index
    %c0_1 = arith.constant 0 : index
    %0 = vector.load %arg3[%c0, %c0_0, %c0_1] : memref<2x8x128xf32, #tpu.memory_space<vmem>>, vector<2x8x128xf32>
    %cst = arith.constant dense<0.000000e+00> : vector<8x128xf32>
    %1 = vector.multi_reduction <add>, %0, %cst [0] : vector<2x8x128xf32> to vector<8x128xf32>
    %cst_2 = arith.constant 5.000000e-01 : f32
    %2 = vector.broadcast %cst_2 : f32 to vector<8x128xf32>
    %3 = arith.mulf %1, %2 : vector<8x128xf32>
    %4 = arith.mulf %3, %3 : vector<8x128xf32>
    %5 = vector.shape_cast %4 : vector<8x128xf32> to vector<1x8x128xf32>
    %cst_3 = arith.constant dense<0.000000e+00> : vector<8x128xf32>
    %6 = vector.multi_reduction <add>, %5, %cst_3 [0] : vector<1x8x128xf32> to vector<8x128xf32>
    %7 = vector.shape_cast %6 : vector<8x128xf32> to vector<1x8x128xf32>
    %c0_i32 = arith.constant 0 : i32
    %8 = arith.cmpi eq, %arg1, %c0_i32 : i32
    %9 = arith.extui %8 : i1 to i32
    %c0_i32_4 = arith.constant 0 : i32
    %10 = arith.cmpi ne, %9, %c0_i32_4 : i32
    scf.if %10 {
      %c0_7 = arith.constant 0 : index
      %c0_8 = arith.constant 0 : index
      %c0_9 = arith.constant 0 : index
      %14 = vector.load %arg4[%c0_7, %c0_8, %c0_9] : memref<1x8x128xf32, #tpu.memory_space<vmem>>, vector<1x8x128xf32>
      tpu.vector_store %arg4[%c0_7, %c0_8, %c0_9], %7 {strides = array<i32>} : memref<1x8x128xf32, #tpu.memory_space<vmem>>, vector<1x8x128xf32>,
    } else {
    }
    %c0_i32_5 = arith.constant 0 : i32
    %11 = arith.cmpi sgt, %arg1, %c0_i32_5 : i32
    %12 = arith.extui %11 : i1 to i32
    %c0_i32_6 = arith.constant 0 : i32
    %13 = arith.cmpi ne, %12, %c0_i32_6 : i32
    scf.if %13 {
      %c0_7 = arith.constant 0 : index
      %c0_8 = arith.constant 0 : index
      %c0_9 = arith.constant 0 : index
      %14 = vector.load %arg4[%c0_7, %c0_8, %c0_9] : memref<1x8x128xf32, #tpu.memory_space<vmem>>, vector<1x8x128xf32>
      %15 = arith.addf %14, %7 : vector<1x8x128xf32>
      %c0_10 = arith.constant 0 : index
      %c0_11 = arith.constant 0 : index
      %c0_12 = arith.constant 0 : index
      %16 = vector.load %arg4[%c0_10, %c0_11, %c0_12] : memref<1x8x128xf32, #tpu.memory_space<vmem>>, vector<1x8x128xf32>
      tpu.vector_store %arg4[%c0_10, %c0_11, %c0_12], %15 {strides = array<i32>} : memref<1x8x128xf32, #tpu.memory_space<vmem>>, vector<1x8x128xf32>,
    } else {
    }
    return
  }
  func.func @transform_0(%arg0: i32, %arg1: i32, %arg2: i32) -> (i32, i32, i32) {
    %c1_i32 = arith.constant 1 : i32
    %0 = arith.muli %arg0, %c1_i32 : i32
    %1 = arith.addi %0, %arg1 : i32
    %c0_i32 = arith.constant 0 : i32
    %c0_i32_0 = arith.constant 0 : i32
    return %arg2, %1, %c0_i32 : i32, i32, i32
  }
  func.func @transform_1(%arg0: i32, %arg1: i32, %arg2: i32) -> (i32, i32, i32) {
    %c0_i32 = arith.constant 0 : i32
    %c0_i32_0 = arith.constant 0 : i32
    %c0_i32_1 = arith.constant 0 : i32
    return %arg0, %c0_i32, %c0_i32_0 : i32, i32, i32
  }
}

</mosaic_0001>

<bundles_post_ra>
// kernel: tpu_custom_call.1
= control target key start
LH: loop header
LB: loop body
LE: loop exit
PB: predicated region body
PF: predicated region fallthrough
CT: control target
= control target key end

     0   :  { %6 = vsyncpa [#allocation3], 0  ;;  %s128_s0 = inlined_call_operand.hbm [shape: f32[2,8,128], index: 0, kind: input, shape index: {}]   ;;  %s129_s1 = inlined_call_operand.hbm [shape: f32[1,8,128], index: 1, kind: output, shape index: {}]  }
   0x1   :  { %7 = vsyncpa [#allocation4], 0  ;;  %s108_s6 = smov [#allocation2]  }
   0x2   :  { %s16_s7 = sshll.u32 %s108_s6, 4  ;;  %s17_s7 = int_to_ptr.vmem [resolvable:$true] %s16_s7 }
   0x3   :  { %s72_s8 = scalar_lea.vmem %s17_s7, 256  ;;  %p77_p1 = scmp.lt.s32.totalorder %s17_s7, %s17_s7 }
   0x4   :  { %p73_p0 = scmp.ne.s32.totalorder %s17_s7, %s72_s8  ;;  %p78_p2 = scmp.lt.s32.totalorder %s72_s8, %s72_s8 }
   0x6   :  { %p79_p3 = por %p78_p2, %p77_p1 }
   0x8   :  { %p80_p4 = pnand %p79_p3, %p73_p0 }
   0xa   :  { %83 = shalt.err (!%p80_p4)
}
   0xb   :  { %s109_s9 = smov 128   ;;  %s110_s10 = smov 8  }
   0xc   :  { %22 = dma.hbm_to_vmem [thread:$0]  %s128_s0, 256, %s17_s7, [#allocation3], %s109_s9, %s109_s9, %s110_s10  }
   0xd   :  { %104 = dma.done.wait [#allocation3], 256  }
   0xe   :  { %105 = vsyncadd [#allocation3], 4294967040  ;;  %v27_v0 = vld [vmem:[#allocation2] sm:$0xff]  ;;  %v28_v1 = vld [vmem:[#allocation2 + $0x8] sm:$0xff]  ;;  %s111_s13 = smov [#allocation5]  }
   0xf   :  { %v29_v2 = vadd.f32 %v28_v1, %v27_v0  ;;  %s51_s14 = sshll.u32 %s111_s13, 4  ;;  %s52_s14 = int_to_ptr.vmem [resolvable:$true] %s51_s14 }
  0x10   :  { %s84_s15 = scalar_lea.vmem %s52_s14, 128  ;;  %p89_p6 = scmp.lt.s32.totalorder %s52_s14, %s52_s14 }
  0x11   :  { %v30_v3 = vmul.f32 0.5, %v29_v2  ;;  %p85_p5 = scmp.ne.s32.totalorder %s52_s14, %s84_s15  ;;  %p90_p7 = scmp.lt.s32.totalorder %s84_s15, %s84_s15 }
  0x13   :  { %v31_v4 = vmul.f32 %v30_v3, %v30_v3  ;;  %p91_p8 = por %p90_p7, %p89_p6 }
  0x15   :  { %37 = vst [vmem:[#allocation5] sm:$0xff] %v31_v4  ;;  %p92_p9 = pnand %p91_p8, %p85_p5 }
  0x17   :  { %95 = shalt.err (!%p92_p9)
}
  0x18   :  { %54 = dma.vmem_to_hbm [thread:$0]  %s52_s14, 128, %s129_s1, [#allocation4]  }
  0x19   :  { %106 = dma.done.wait [#allocation4], 128  }
  0x1a   :  { %107 = vsyncadd [#allocation4], 4294967168 }
  0x1b   :  { %58 = vsyncpa [#allocation3], 1 }
  0x1c   :  { %59 = vsyncpa [#allocation4], 1 }

</bundles_post_ra>
